<compile_context>
chip_gen: v5e
topology: v5e:2x2
jax: 0.10.0
libtpu: 0.0.40
codegen_flags: <defaults>
</compile_context>

<pallas_src>
import jax
import jax.numpy as jnp
from jax import lax
from jax.experimental import pallas as pl
from jax.experimental.pallas import tpu as pltpu


def _round_up(x, m):
    return -(-x // m) * m


def _emb_kernel(tokens_ref, table_ref, out_ref):
    # tokens_ref: [M, 2] int32   (col 0: token id, col 1: pos slot in augmented vocab)
    # table_ref : [V_aug, E]     compute_dtype (emb table ++ pos rows ++ zero pad)
    # out_ref   : [M, E]         out_dtype
    v_aug = table_ref.shape[0]
    toks = tokens_ref[...]                                    # [M, 2]
    tok = toks[:, 0:1]                                        # [M, 1]
    pos = toks[:, 1:2]                                        # [M, 1]
    col = lax.broadcasted_iota(jnp.int32, (1, v_aug), 1)      # [1, V_aug] lane iota
    # Two hot columns per row -> MXU matmul does gather + positional add in one pass.
    onehot = jnp.logical_or(tok == col, pos == col).astype(table_ref.dtype)  # [M, V_aug]
    acc = jnp.dot(onehot, table_ref[...], preferred_element_type=jnp.float32)
    out_ref[...] = acc.astype(out_ref.dtype)


def pos_action_tokenized_spread_embedding(tokens, action_emb_table, action_pos_emb,
                                          *, row_block=1024,
                                          compute_dtype=jnp.bfloat16,
                                          out_dtype=jnp.float32):
    """tokens: int32 [bs, seq_len, action_dim]
       action_emb_table: float32 [token_size, emb_dim]
       action_pos_emb:   float32 [max_num_actions, emb_dim]
       returns out_dtype [bs, seq_len, action_dim, emb_dim]"""
    bs, seq_len, action_dim = tokens.shape
    token_size, emb_dim = action_emb_table.shape
    rows = bs * seq_len

    # --- tile sizing --------------------------------------------------------
    # Keep row_block a sublane multiple, never larger than requested, and keep the
    # grid >= 2 steps whenever the input allows (v7x has 2 TensorCores).
    if rows >= 16:
        rb_cap = _round_up(max(rows // 2, 8), 8)
    else:
        rb_cap = _round_up(max(rows, 1), 8)
    row_block = max(8, min(_round_up(row_block, 8), rb_cap))
    padded_rows = _round_up(rows, row_block)
    m_block = row_block * action_dim              # multiple of 8 (row_block is)
    m_total = padded_rows * action_dim

    # --- augmented table: [emb table ; pos rows ; zero pad] ------------------
    v_aug = _round_up(token_size + action_dim, 128)
    aug = jnp.zeros((v_aug, emb_dim), jnp.float32)
    aug = aug.at[:token_size, :].set(action_emb_table.astype(jnp.float32))
    aug = aug.at[token_size:token_size + action_dim, :].set(
        action_pos_emb[:action_dim, :].astype(jnp.float32))
    aug = aug.astype(compute_dtype)

    # --- tokens: one row per output row: [token_id, token_size + (row % action_dim)] --
    tok_flat = tokens.reshape(rows, action_dim).astype(jnp.int32)
    if padded_rows != rows:
        tok_flat = jnp.pad(tok_flat, ((0, padded_rows - rows), (0, 0)))
    tok_col = tok_flat.reshape(m_total, 1)
    pos_col = jnp.tile(jnp.arange(action_dim, dtype=jnp.int32) + token_size,
                       (padded_rows,)).reshape(m_total, 1)
    tok2 = jnp.concatenate([tok_col, pos_col], axis=1)        # [m_total, 2]

    grid = (padded_rows // row_block,)

    # --- VMEM budget / compiler params --------------------------------------
    cdt = jnp.dtype(compute_dtype).itemsize
    odt = jnp.dtype(out_dtype).itemsize
    e_pad = _round_up(emb_dim, 128)
    tok_tile = m_block * 128 * 4                  # [M, 2] int32 lane-pads to 128 lanes
    out_tile = m_block * e_pad * odt
    onehot_tile = m_block * v_aug * cdt           # in-kernel matmul operand
    table_bytes = v_aug * e_pad * cdt             # single buffer (Buffered(1))
    vmem_est = 2 * tok_tile + 2 * out_tile + onehot_tile + table_bytes
    # Raise the scoped VMEM limit past v5e's 16 MiB default, stay below v7x's 64 MiB.
    vmem_limit = int(min(max(vmem_est + (8 << 20), 32 << 20), 56 << 20))

    cost = pl.CostEstimate(
        flops=2 * m_total * v_aug * emb_dim,
        transcendentals=0,
        bytes_accessed=int(tok2.size * 4 + aug.size * cdt + m_total * emb_dim * odt),
    )

    out = pl.pallas_call(
        _emb_kernel,
        out_shape=jax.ShapeDtypeStruct((m_total, emb_dim), out_dtype),
        grid=grid,
        in_specs=[
            pl.BlockSpec((m_block, 2), lambda i: (i, 0)),
            # Constant index_map -> fetched into VMEM once; one buffer is enough.
            pl.BlockSpec((v_aug, emb_dim), lambda i: (0, 0),
                         pipeline_mode=pl.Buffered(1)),
        ],
        out_specs=pl.BlockSpec((m_block, emb_dim), lambda i: (i, 0)),
        compiler_params=pltpu.CompilerParams(
            dimension_semantics=("parallel",),
            vmem_limit_bytes=vmem_limit,
        ),
        cost_estimate=cost,
    )(tok2, aug)

    out = out[: rows * action_dim].reshape(bs, seq_len, action_dim, emb_dim)
    return out


if __name__ == "__main__":
    # Module hyper-params (small, consistent with the PyTorch __init__).
    action_dim = 6
    embedding_dim = 128
    token_size = 128
    max_num_actions = 100
    bs, seq_len = 2, 8

    key = jax.random.PRNGKey(0)
    k_tab, k_pos, k_tok = jax.random.split(key, 3)

    # nn.Embedding(token_size, embedding_dim).weight -> [token_size, emb_dim]
    # nn.Parameter(torch.rand(max_num_actions, emb)) -> [max_num_actions, emb_dim]
    action_emb_table = jax.random.normal(k_tab, (token_size, embedding_dim), jnp.float32)
    action_pos_emb = jax.random.uniform(k_pos, (max_num_actions, embedding_dim), jnp.float32)
    tokens = jax.random.randint(k_tok, (bs, seq_len, action_dim), 0, token_size, jnp.int32)

    # Fast (default, bf16-compute) path.
    out = pos_action_tokenized_spread_embedding(tokens, action_emb_table, action_pos_emb)
    out = jax.block_until_ready(out)
    assert out.shape == (bs, seq_len, action_dim, embedding_dim)

    # Exact reference for the bf16 compute path: the one-hot selection is exact, the
    # only difference vs the f32 module is the bf16 rounding of the stored weights.
    tab_q = action_emb_table.astype(jnp.bfloat16).astype(jnp.float32)
    pos_q = action_pos_emb.astype(jnp.bfloat16).astype(jnp.float32)
    ref_q = tab_q[tokens] + pos_q[:action_dim, :]
    assert jnp.allclose(out, ref_q, atol=1e-5, rtol=1e-5), "mismatch vs bf16-exact reference"

    # Fidelity vs the pure-f32 PyTorch forward (bounded by bf16 weight rounding).
    ref_f32 = action_emb_table[tokens] + action_pos_emb[:action_dim, :]
    assert jnp.allclose(out, ref_f32, atol=1e-1, rtol=1e-1), "drift vs f32 reference"

    # Full-precision path matches the module to float tolerance.
    out_f32 = pos_action_tokenized_spread_embedding(
        tokens, action_emb_table, action_pos_emb, compute_dtype=jnp.float32)
    out_f32 = jax.block_until_ready(out_f32)
    assert jnp.allclose(out_f32, ref_f32, atol=1e-5, rtol=1e-5), "mismatch vs f32 reference"

    print("KERNEL_OK")
</pallas_src>

<mosaic_0001>
module attributes {stable_mosaic.version = 11 : i64} {
  func.func @_emb_kernel(%arg0: i32, %arg1: memref<48x2xi32, #tpu.memory_space<vmem>>, %arg2: memref<256x128xbf16, #tpu.memory_space<vmem>>, %arg3: memref<48x128xf32, #tpu.memory_space<vmem>>) attributes {dimension_semantics = [#tpu.dimension_semantics<parallel>], iteration_bounds = array<i64: 2>, scalar_prefetch = 0 : i64, scratch_operands = 0 : i64, tpu.core_type = #tpu.core_type<tc>, window_params = [{transform_indices = @transform_0, window_bounds = array<i64: 48, 2>}, {pipeline_mode = #tpu.pipeline_mode<synchronous>, transform_indices = @transform_1, window_bounds = array<i64: 256, 128>}, {transform_indices = @transform_2, window_bounds = array<i64: 48, 128>}]} {
    %c0 = arith.constant 0 : index
    %c0_0 = arith.constant 0 : index
    %0 = vector.load %arg1[%c0, %c0_0] : memref<48x2xi32, #tpu.memory_space<vmem>>, vector<48x2xi32>
    %1 = vector.extract_strided_slice %0 {offsets = [0, 0], sizes = [48, 1], strides = [1, 1]} : vector<48x2xi32> to vector<48x1xi32>
    %2 = vector.extract_strided_slice %0 {offsets = [0, 1], sizes = [48, 1], strides = [1, 1]} : vector<48x2xi32> to vector<48x1xi32>
    %3 = tpu.iota {dimensions = array<i32: 1>} : vector<1x256xi32>
    %4 = vector.broadcast %1 : vector<48x1xi32> to vector<48x256xi32>
    %5 = vector.broadcast %3 : vector<1x256xi32> to vector<48x256xi32>
    %6 = arith.cmpi eq, %4, %5 : vector<48x256xi32>
    %7 = vector.broadcast %2 : vector<48x1xi32> to vector<48x256xi32>
    %8 = vector.broadcast %3 : vector<1x256xi32> to vector<48x256xi32>
    %9 = arith.cmpi eq, %7, %8 : vector<48x256xi32>
    %10 = arith.ori %6, %9 : vector<48x256xi1>
    %11 = arith.extui %10 : vector<48x256xi1> to vector<48x256xi32>
    %12 = arith.sitofp %11 : vector<48x256xi32> to vector<48x256xf32>
    %13 = arith.truncf %12 : vector<48x256xf32> to vector<48x256xbf16>
    %c0_1 = arith.constant 0 : index
    %c0_2 = arith.constant 0 : index
    %14 = vector.load %arg2[%c0_1, %c0_2] : memref<256x128xbf16, #tpu.memory_space<vmem>>, vector<256x128xbf16>
    %cst = arith.constant dense<0.000000e+00> : vector<48x128xf32>
    %15 = tpu.matmul %13, %14, %cst {dimension_numbers = #tpu.dot_dimension_numbers<[1], [0], [0], [1], [0, 0, 1, 1], [], []>} : vector<48x256xbf16>, vector<256x128xbf16>, vector<48x128xf32> -> vector<48x128xf32>
    %c0_3 = arith.constant 0 : index
    %c0_4 = arith.constant 0 : index
    %16 = vector.load %arg3[%c0_3, %c0_4] : memref<48x128xf32, #tpu.memory_space<vmem>>, vector<48x128xf32>
    tpu.vector_store %arg3[%c0_3, %c0_4], %15 {strides = array<i32>} : memref<48x128xf32, #tpu.memory_space<vmem>>, vector<48x128xf32>,
    return
  }
  func.func @transform_0(%arg0: i32) -> (i32, i32) {
    %c0_i32 = arith.constant 0 : i32
    %c0_i32_0 = arith.constant 0 : i32
    return %arg0, %c0_i32 : i32, i32
  }
  func.func @transform_1(%arg0: i32) -> (i32, i32) {
    %c0_i32 = arith.constant 0 : i32
    %c0_i32_0 = arith.constant 0 : i32
    %c0_i32_1 = arith.constant 0 : i32
    return %c0_i32, %c0_i32_0 : i32, i32
  }
  func.func @transform_2(%arg0: i32) -> (i32, i32) {
    %c0_i32 = arith.constant 0 : i32
    %c0_i32_0 = arith.constant 0 : i32
    return %arg0, %c0_i32 : i32, i32
  }
}

</mosaic_0001>

<bundles_post_ra>
// kernel: tpu_custom_call.1
= control target key start
LH: loop header
LB: loop body
LE: loop exit
PB: predicated region body
PF: predicated region fallthrough
CT: control target
= control target key end

     0   :  { %7 = vsyncpa [#allocation3], 0  ;;  %s989_s0 = inlined_call_operand.vmem [shape: s32[96,2], index: 0, kind: input, shape index: {}]   ;;  %s990_s1 = inlined_call_operand.hbm [shape: bf16[256,128], index: 1, kind: input, shape index: {}]   ;;  %s991_s2 = inlined_call_operand.hbm [shape: f32[96,128], index: 2, kind: output, shape index: {}]  }
   0x1   :  { %8 = vsyncpa [#allocation4], 0 }
   0x2   :  { %10 = vsyncpa [#allocation4 + $0x1], 0  ;;  %s861_s9 = smov 0   ;;  %s863_s10 = smov 0  }
   0x3   :  { %s865_s11 = smov 0   ;;  %s867_s12 = smov 0  }
   0x4 LB: > { %s882_s13 = sadd.s32 4294967295, %s836_s12   ;;  %s545_s14 = sadd.s32 4294967294, %s836_s12   ;;  %s836_s12 = sphi %s867_s12, %s1007_s12   ;;  %s832_s11 = sphi %s865_s11, %s1006_s11   ;;  %s828_s10 = sphi %s863_s10, %s1005_s10   ;;  %s824_s9 = sphi %s861_s9, %s1004_s9  }
   0x5   : > { %s886_s15 = sadd.s32 1, %s836_s12   ;;  %s70_s16 = sadd.s32 1, %s832_s11 }
   0x6   : > { %s67_s17 = ssub.s32 %s836_s12, %s886_s15  ;;  %p80_p0 = scmp.ne.s32.totalorder %s832_s11, %s828_s10 }
   0x7   : > { %p68_p1 = scmp.eq.s32.totalorder %s67_s17, 0  ;;  %p81_p2 = scmp.eq.s32.totalorder %s882_s13, 1 }
   0x8   : > { %p86_p3 = scmp.ne.s32.totalorder %s828_s10, %s824_s9  ;;  %p87_p4 = scmp.eq.s32.totalorder %s545_s14, 1 }
   0x9   : > { %s897_s18 = scalar_select %p68_p1, %s832_s11, %s70_s16  }
   0xa   : > { %p899_p5 = por %p81_p2, %p80_p0  ;;  %p903_p6 = por %p87_p4, %p86_p3 }
   0xb   : > { %p546_p7 = scmp.ge.s32.totalorder %s836_s12, 1  ;;  %p94_p8 = scmp.lt.s32.totalorder %s836_s12, 3 }
   0xc   : > { %p691_p9 = scmp.eq.s32.totalorder %s882_s13, 0  ;;  %s105_s23 = sshll.u32 %s990_s1, 4  ;;  %s106_s23 = int_to_ptr.hbm [resolvable:$true] %s105_s23 }
   0xd   : > { %p95_p10 = pnand %p546_p7, %p94_p8  ;;  %s838_s24 = smov [#allocation2]  }
   0xe   : > { %s107_s25 = sshll.u32 %s838_s24, 4  ;;  %s839_s26 = smov 64   ;;  %s108_s25 = int_to_ptr.vmem [resolvable:$true] %s107_s25 }
   0xf   : > { %p683_p11 = pneg %p95_p10  ;;  %s840_s27 = smov 4  }
  0x10   : > { %132 = sbr.rel (%p95_p10) target bundleno = 320 (0x140), region = 28 }
  0x11   : > { %p684_p12 = pnand %p691_p9, %p683_p11 }
  0x13   : > { %686 = dma.hbm_to_vmem [thread:$0]  (!%p684_p12), %s106_s23, 2048, %s108_s25, [#allocation3], %s839_s26, %s839_s26, %s840_s27  }
  0x15   : > { %815 = dma.done.wait (%p691_p9), [#allocation3], 2048  }
  0x16   : > { %817 = vsyncadd (%p691_p9), [#allocation3], 4294965248  ;;  %s155_s28 = smul.u32 6, %s882_s13  ;;  %v841_v0 = vmov 1   ;;  %v842_v1 = vmov 0   ;;  %v650_v2 = vld [vmem:[#allocation2 + $0x38] sm:$0xff]  ;;  %v168_v25 = vlaneseq }
  0x17   : > { %735 = vset.pattern.permute.xlu1 %v841_v0  ;;  %734 = vset.pattern.permute.xlu0 %v842_v1  ;;  %v658_v3 = vld [vmem:[#allocation2 + $0x78] sm:$0xff]  ;;  %v649_v10 = vld [vmem:[#allocation2 + $0x30] sm:$0xff]  ;;  %v648_v12 = vld [vmem:[#allocation2 + $0x28] sm:$0xff]  ;;  %v843_v34 = vmov 1.0|1.0   ;;  %s152_s5 = sand.u32 1, %s828_s10  }
  0x18   : > { %p156_p13 = scmp.lt.s32.totalorder %s155_s28, 11  ;;  %736 = vset.pattern.permute.xlu2 %v842_v1  ;;  %660 = vmatpush.bf16.msra.mxu2 %v650_v2  ;;  %v657_v11 = vld [vmem:[#allocation2 + $0x70] sm:$0xff]  ;;  %v656_v13 = vld [vmem:[#allocation2 + $0x68] sm:$0xff]  ;;  %v647_v14 = vld [vmem:[#allocation2 + $0x20] sm:$0xff]  ;;  %v169_v27 = vand.u32 127, %v168_v25  ;;  %s676_s6 = smul.u32 48, %s152_s5 }
  0x19   : > { %668 = vmatpush.bf16.msra.mxu3 %v658_v3  ;;  %401 = vmatpush.bf16.msra.mxu0 %v650_v2  ;;  %v655_v15 = vld [vmem:[#allocation2 + $0x60] sm:$0xff]  ;;  %v646_v16 = vld [vmem:[#allocation2 + $0x18] sm:$0xff]  ;;  %v645_v18 = vld [vmem:[#allocation2 + $0x10] sm:$0xff]  ;;  %s659_s8 = smul.u32 48, %s882_s13  ;;  %s456_s13 = scalar_lea.sflag [#allocation4], %s152_s5 }
  0x1a   : > { %s1009_s28 = smov (!%p156_p13, %s155_s28), 11  ;;  %425 = vmatpush.bf16.msra.mxu1 %v658_v3  ;;  %v654_v17 = vld [vmem:[#allocation2 + $0x58] sm:$0xff]  ;;  %v653_v19 = vld [vmem:[#allocation2 + $0x50] sm:$0xff]  ;;  %v644_v20 = vld [vmem:[#allocation2 + $0x8] sm:$0xff]  ;;  %v170_v30 = vadd.s32 128, %v169_v27  ;;  %s154_s7 = scalar_lea.vmem [#allocation5], %s676_s6 }
  0x1b   : > { %s551_s29 = sshll.u32 %s1009_s28, 3  ;;  %v652_v21 = vld [vmem:[#allocation2 + $0x48] sm:$0xff]  ;;  %v643_v22 = vld [vmem:[#allocation2] sm:$0xff]  ;;  %s467_s17 = scalar_lea.hbm %s991_s2, %s659_s8 }
  0x1c   : > { %s159_s4 = scalar_lea.vmem %s989_s0, %s551_s29  ;;  %661 = vmatpush.bf16.msra.mxu2 %v649_v10  ;;  %v651_v23 = vld [vmem:[#allocation2 + $0x40] sm:$0xff]  ;;  %s468_s21 = sshll.u32 %s154_s7, 4  ;;  %s469_s21 = int_to_ptr.vmem [resolvable:$true] %s468_s21 }
  0x1d   : > { %v164_v4 = vld [vmem:[%s159_s4 + $0x10] sm:$0xff]  ;;  %v166_v5 = vld [vmem:[%s159_s4 + $0x20] sm:$0xff]  ;;  %v165_v6 = vld [vmem:[%s159_s4 + $0x18] sm:$0xff]  ;;  %669 = vmatpush.bf16.msra.mxu3 %v657_v11  ;;  %402 = vmatpush.bf16.msra.mxu0 %v649_v10  ;;  %s470_s22 = sshll.u32 %s467_s17, 4  ;;  %s790_s27 = scalar_lea.hbm %s991_s2, 96  ;;  %s471_s22 = int_to_ptr.hbm [resolvable:$true] %s470_s22 }
  0x1e   : > { %208 = vperm.xlu1 %735, %v164_v4   ;;  %178 = vperm.xlu0 %734, %v164_v4   ;;  %v167_v7 = vld [vmem:[%s159_s4 + $0x28] sm:$0xff]  ;;  %v162_v8 = vld [vmem:[%s159_s4] sm:$0xff]  ;;  %s784_s23 = sshra.s32 %s471_s22, 4  ;;  %s785_s23 = int_to_ptr.hbm [resolvable:$true] %s784_s23 }
  0x1f   : > { %184 = vperm.xlu2 %736, %v166_v5   ;;  %v163_v9 = vld [vmem:[%s159_s4 + $0x8] sm:$0xff]  ;;  %426 = vmatpush.bf16.msra.mxu1 %v657_v11  ;;  %s786_s24 = scalar_lea.hbm %s785_s23, 48  ;;  %p791_p3 = scmp.lt.s32.totalorder %s785_s23, %s991_s2 }
  0x20   : > { %662 = vmatpush.bf16.msra.mxu2 %v648_v12  ;;  %p787_p0 = scmp.ne.s32.totalorder %s785_s23, %s786_s24  ;;  %p792_p4 = scmp.lt.s32.totalorder %s790_s27, %s786_s24 }
  0x21   : > { %670 = vmatpush.bf16.msra.mxu3 %v656_v13  ;;  %403 = vmatpush.bf16.msra.mxu0 %v648_v12 }
  0x22   : > { %p788_p1 = pnand %p787_p0, %p899_p5  ;;  %p793_p7 = por %p792_p4, %p791_p3 }
  0x23   : > { %427 = vmatpush.bf16.msra.mxu1 %v656_v13 }
  0x24   : > { %663 = vmatpush.bf16.msra.mxu2 %v647_v14  ;;  %p789_p2 = pneg %p788_p1 }
  0x25   : > { %671 = vmatpush.bf16.msra.mxu3 %v655_v15  ;;  %404 = vmatpush.bf16.msra.mxu0 %v647_v14 }
  0x26   : > { %211 = vperm.xlu1 %735, %v165_v6   ;;  %181 = vperm.xlu0 %734, %v165_v6   ;;  %p794_p8 = pnand %p793_p7, %p789_p2 }
  0x27   : > { %187 = vperm.xlu2 %736, %v167_v7   ;;  %428 = vmatpush.bf16.msra.mxu1 %v655_v15 }
  0x28   : > { %664 = vmatpush.bf16.msra.mxu2 %v646_v16 }
  0x29   : > { %672 = vmatpush.bf16.msra.mxu3 %v654_v17  ;;  %405 = vmatpush.bf16.msra.mxu0 %v646_v16 }
  0x2b   : > { %429 = vmatpush.bf16.msra.mxu1 %v654_v17 }
  0x2c   : > { %665 = vmatpush.bf16.msra.mxu2 %v645_v18 }
  0x2d   : > { %673 = vmatpush.bf16.msra.mxu3 %v653_v19  ;;  %406 = vmatpush.bf16.msra.mxu0 %v645_v18 }
  0x2e   : > { %217 = vperm.xlu1 %735, %v167_v7   ;;  %737 = vset.pattern.permute.xlu0 %v841_v0 }
  0x2f   : > { %214 = vperm.xlu0 %737, %v166_v5   ;;  %172 = vperm.xlu2 %736, %v162_v8  }
  0x30   : > { %430 = vmatpush.bf16.msra.mxu1 %v653_v19  ;;  %666 = vmatpush.bf16.msra.mxu2 %v644_v20 }
  0x31   : > { %674 = vmatpush.bf16.msra.mxu3 %v652_v21  ;;  %407 = vmatpush.bf16.msra.mxu0 %v644_v20 }
  0x34   : > { %431 = vmatpush.bf16.msra.mxu1 %v652_v21  ;;  %667 = vmatpush.bf16.msra.mxu2 %v643_v22 }
  0x35   : > { %675 = vmatpush.bf16.msra.mxu3 %v651_v23  ;;  %408 = vmatpush.bf16.msra.mxu0 %v643_v22 }
  0x36   : > { %738 = vset.pattern.permute.xlu1 %v842_v1 }
  0x37   : > { %205 = vperm.xlu0 %737, %v163_v9   ;;  %175 = vperm.xlu1 %738, %v163_v9  }
  0x38   : > { %739 = vset.pattern.permute.xlu2 %v841_v0  ;;  %432 = vmatpush.bf16.msra.mxu1 %v651_v23 }
  0x39   : > { %202 = vperm.xlu2 %739, %v162_v8  }
  0x79   : > { %v185_v24 = vpop.permute.xlu2 %184 }
  0x81   : > { %v188_v26 = vpop.permute.xlu2 %187 }
  0x89   : > { %v173_v31 = vpop.permute.xlu2 %172 }
  0x8a   : > { %vm189_vm14 = vcmp.eq.s32.totalorder %v173_v31, %v169_v27 }
  0x90   : > { %v209_v28 = vpop.permute.xlu1 %208  ;;  %v179_v29 = vpop.permute.xlu0 %178 }
  0x91   : > { %vm223_vm0 = vcmp.eq.s32.totalorder %v209_v28, %v169_v27  ;;  %vm193_vm1 = vcmp.eq.s32.totalorder %v179_v29, %v169_v27  ;;  %vm224_vm2 = vcmp.eq.s32.totalorder %v209_v28, %v170_v30  ;;  %vm194_vm3 = vcmp.eq.s32.totalorder %v179_v29, %v170_v30 }
  0x92   : > { %vm235_vm4 = vmor %vm193_vm1, %vm223_vm0 }
  0x93   : > { %vm236_vm9 = vmor %vm194_vm3, %vm224_vm2  ;;  %v203_v35 = vpop.permute.xlu2 %202  ;;  %vm199_vm2 = vcmp.eq.s32.totalorder %v188_v26, %v169_v27 }
  0x94   : > { %vm219_vm15 = vcmp.eq.s32.totalorder %v203_v35, %v169_v27 }
  0x98   : > { %v212_v32 = vpop.permute.xlu1 %211  ;;  %v182_v33 = vpop.permute.xlu0 %181 }
  0x99   : > { %vm225_vm5 = vcmp.eq.s32.totalorder %v212_v32, %v169_v27  ;;  %vm226_vm6 = vcmp.eq.s32.totalorder %v212_v32, %v170_v30  ;;  %vm195_vm7 = vcmp.eq.s32.totalorder %v182_v33, %v169_v27  ;;  %vm196_vm8 = vcmp.eq.s32.totalorder %v182_v33, %v170_v30 }
  0x9a   : > { %vm237_vm10 = vmor %vm195_vm7, %vm225_vm5  ;;  %vm197_vm5 = vcmp.eq.s32.totalorder %v185_v24, %v169_v27 }
  0x9b   : > { %vm630_vm11 = vmpackc.low %vm237_vm10, %vm235_vm4 }
  0x9c   : > { %631 = vmatmul.msk.bf16.vlgmr.msra.gmra.mxu2 %vm630_vm11, %v843_v34  ;;  %vm238_vm12 = vmor %vm196_vm8, %vm226_vm6  ;;  %vm198_vm6 = vcmp.eq.s32.totalorder %v185_v24, %v170_v30  ;;  %vm190_vm8 = vcmp.eq.s32.totalorder %v173_v31, %v170_v30 }
  0x9d   : > { %vm636_vm13 = vmpackc.low %vm238_vm12, %vm236_vm9  ;;  %vm220_vm9 = vcmp.eq.s32.totalorder %v203_v35, %v170_v30  ;;  %vm200_vm12 = vcmp.eq.s32.totalorder %v188_v26, %v170_v30 }
  0x9e   : > { %637 = vmatmul.msk.bf16.vlgmr.msra.gmra.mxu3 %vm636_vm13, %v843_v34  ;;  %vm923_vm7 = vmor %vm189_vm14, %vm219_vm15 }
  0x9f   : > { %vm939_vm15 = vmor %vm190_vm8, %vm220_vm9 }
  0xa0   : > { %v218_v36 = vpop.permute.xlu1 %217 }
  0xa1   : > { %vm229_vm0 = vcmp.eq.s32.totalorder %v218_v36, %v169_v27  ;;  %v215_v37 = vpop.permute.xlu0 %214  ;;  %vm230_vm4 = vcmp.eq.s32.totalorder %v218_v36, %v170_v30 }
  0xa2   : > { %vm227_vm1 = vcmp.eq.s32.totalorder %v215_v37, %v169_v27  ;;  %vm228_vm3 = vcmp.eq.s32.totalorder %v215_v37, %v170_v30  ;;  %vm927_vm10 = vmor %vm199_vm2, %vm229_vm0 }
  0xa3   : > { %vm931_vm11 = vmor %vm197_vm5, %vm227_vm1 }
  0xa4   : > { %vm935_vm13 = vmor %vm198_vm6, %vm228_vm3 }
  0xa5   : > { %vm242_vm14 = vmor %vm200_vm12, %vm230_vm4 }
  0xa6   : > { %vm632_vm0 = vmpackc.low %vm927_vm10, %vm931_vm11 }
  0xa7   : > { %vm638_vm4 = vmpackc.low %vm242_vm14, %vm935_vm13 }
  0xa9   : > { %v206_v43 = vpop.permute.xlu0 %205  ;;  %v176_v44 = vpop.permute.xlu1 %175 }
  0xaa   : > { %vm221_vm1 = vcmp.eq.s32.totalorder %v206_v43, %v169_v27  ;;  %vm222_vm2 = vcmp.eq.s32.totalorder %v206_v43, %v170_v30  ;;  %vm191_vm3 = vcmp.eq.s32.totalorder %v176_v44, %v169_v27  ;;  %vm192_vm5 = vcmp.eq.s32.totalorder %v176_v44, %v170_v30 }
  0xab   : > { %vm233_vm6 = vmor %vm191_vm3, %vm221_vm1 }
  0xac   : > { %vm234_vm8 = vmor %vm192_vm5, %vm222_vm2  ;;  %633 = vmatmul.msk.bf16.gmra.mxu2 %vm632_vm0, %v843_v34 }
  0xad   : > { %vm628_vm9 = vmpackc.low %vm233_vm6, %vm923_vm7 }
  0xae   : > { %639 = vmatmul.msk.bf16.gmra.mxu3 %vm638_vm4, %v843_v34  ;;  %629 = vmatmul.msk.bf16.vlgmr.msra.gmra.mxu0 %vm628_vm9, %v843_v34  ;;  %vm634_vm12 = vmpackc.low %vm234_vm8, %vm939_vm15 }
  0xaf   : > { %635 = vmatmul.msk.bf16.vlgmr.msra.gmra.mxu1 %vm634_vm12, %v843_v34 }
 0x11f   : > { %v415_v45 = vpop.f32.mrf.mxu2 }
 0x121   : > { %v439_v46 = vpop.f32.mrf.mxu3 }
 0x122   : > { %v440_v47 = vadd.f32 %v439_v46, %v415_v45 }
 0x124   : > { %451 = vst [vmem:[%s154_s7 + $0x10] sm:$0xff] %v440_v47 }
 0x127   : > { %v417_v48 = vpop.f32.mrf.mxu2 }
 0x129   : > { %v441_v49 = vpop.f32.mrf.mxu3 }
 0x12a   : > { %v442_v50 = vadd.f32 %v441_v49, %v417_v48 }
 0x12b   : > { %v410_v51 = vpop.f32.mrf.mxu0 }
 0x12c   : > { %452 = vst [vmem:[%s154_s7 + $0x18] sm:$0xff] %v442_v50  ;;  %v434_v52 = vpop.f32.mrf.mxu1 }
 0x12d   : > { %v435_v53 = vadd.f32 %v434_v52, %v410_v51 }
 0x12f   : > { %449 = vst [vmem:[%s154_s7] sm:$0xff] %v435_v53  ;;  %v420_v54 = vpop.f32.mrf.mxu2 }
 0x131   : > { %v444_v55 = vpop.f32.mrf.mxu3 }
 0x132   : > { %v445_v56 = vadd.f32 %v444_v55, %v420_v54 }
 0x133   : > { %v412_v57 = vpop.f32.mrf.mxu0 }
 0x134   : > { %453 = vst [vmem:[%s154_s7 + $0x20] sm:$0xff] %v445_v56  ;;  %v436_v58 = vpop.f32.mrf.mxu1 }
 0x135   : > { %v437_v59 = vadd.f32 %v436_v58, %v412_v57 }
 0x137   : > { %450 = vst [vmem:[%s154_s7 + $0x8] sm:$0xff] %v437_v59  ;;  %v422_v60 = vpop.f32.mrf.mxu2 }
 0x139   : > { %v446_v61 = vpop.f32.mrf.mxu3 }
 0x13a   : > { %v447_v62 = vadd.f32 %v446_v61, %v422_v60 }
 0x13c   : > { %454 = vst [vmem:[%s154_s7 + $0x28] sm:$0xff] %v447_v62 }
 0x13d   : > { %797 = shalt.err (!%p794_p8)
}
 0x13e   : > { %s844_s30 = smov 128   ;;  %s845_s3 = smov 8  }
 0x13f   : > { %681 = dma.vmem_to_hbm [thread:$0]  (%p899_p5), %s469_s21, 768, %s471_s22, %s456_s13, %s844_s30, %s844_s30, %s845_s3  }
 0x140 PF: > { %p693_p9 = scmp.ge.s32.totalorder %s836_s12, 2  ;;  %s485_s4 = sand.u32 1, %s824_s9  }
 0x141   : > { %s486_s5 = scalar_lea.sflag [#allocation4], %s485_s4 }
 0x142   : > { %p688_p10 = pnand %p693_p9, %p903_p6 }
 0x144   : > { %p689_p11 = pneg %p688_p10 }
 0x146   : > { %819 = dma.done.wait (%p689_p11), %s486_s5, 768  }
 0x147   : > { %821 = vsyncadd (%p689_p11), %s486_s5, 4294966528  ;;  %p13_p12 = scmp.ge.s32.totalorder %s886_s15, 4   ;;  %s1004_s9 = smov %s828_s10 }
 0x148   : > { %s1005_s10 = smov %s832_s11  ;;  %s1006_s11 = smov %s897_s18 }
 0x149   : > { %s1007_s12 = smov %s886_s15  ;;  %15 = sbr.rel (!%p13_p12) target bundleno = 4 (0x4), region = 68 }
 0x14e   :  { %492 = vsyncpa [#allocation3], 1 }
 0x14f   :  { %494 = vsyncpa [#allocation3 + $0x1], 1 }
 0x150   :  { %495 = vsyncpa [#allocation4], 1 }
 0x151   :  { %497 = vsyncpa [#allocation4 + $0x1], 1 }

</bundles_post_ra>
